<compile_context>
chip_gen: v7x
topology: tpu7x:2x2x1
jax: 0.10.0
libtpu: 0.0.40
codegen_flags: <defaults>
</compile_context>

<pallas_src>
import functools

import jax
import jax.numpy as jnp
from jax import lax
from jax.experimental import pallas as pl
from jax.experimental.pallas import tpu as pltpu


def _round_up(n, m):
    return ((n + m - 1) // m) * m


def _mlp_kernel(x_ref, p_ref, o_ref, *, d_in):
    # x_ref: (TILE_B, d_in) natural layout (batch on sublanes)
    # p_ref: (3, d_in + 13) packed params
    # o_ref: (out_dim, TILE_B) lane-dense output (batch on lanes)
    x = x_ref[...]
    p = p_ref[...]

    c = 0
    w1 = p[:, c:c + d_in]; c += d_in          # (3, d_in)  torch (out, in) layout
    b1 = p[:, c:c + 1];    c += 1             # (3, 1)     broadcasts over lanes
    w2 = p[:, c:c + 3];    c += 3             # (3, 3)
    b2 = p[:, c:c + 1];    c += 1
    w3 = p[:, c:c + 3];    c += 3             # (3, 3)
    b3 = p[:, c:c + 1];    c += 1
    w6 = p[0:2, c:c + 3];  c += 3             # (2, 3)
    b6 = p[0:2, c:c + 1]                      # (2, 1)

    # fc1: h^T = W1 . x^T  (contract the feature dim of both operands) -> (3, TILE_B),
    # already lane-dense; bias + ReLU fused on the VPU.
    h = lax.dot_general(w1, x, (((1,), (1,)), ((), ())),
                        preferred_element_type=jnp.float32)
    h = jnp.maximum(h + b1, 0.0)
    # fc2 / fc3 (3->3) and fc6 (3->2): tiny matmuls on the idle MXU (f32 accumulation).
    h = jnp.maximum(jnp.dot(w2, h, preferred_element_type=jnp.float32) + b2, 0.0)
    h = jnp.maximum(jnp.dot(w3, h, preferred_element_type=jnp.float32) + b3, 0.0)
    o_ref[...] = (jnp.dot(w6, h, preferred_element_type=jnp.float32)
                  + b6).astype(o_ref.dtype)


def _pack_params(params):
    """Pack all weights/biases into one (3, d_in + 13) f32 array (single VMEM block).

    Column layout: [w1 | b1 | w2 | b2 | w3 | b3 | w6 | b6], with the (2, .) fc6 tensors
    zero-padded to 3 rows.  Weights stay in PyTorch (out, in) layout; biases are columns
    so they broadcast over the lane (batch) axis inside the kernel.
    """
    w6p = jnp.zeros((3, 3), jnp.float32).at[0:2, :].set(params["w6"])
    b6p = jnp.zeros((3, 1), jnp.float32).at[0:2, :].set(params["b6"])
    return jnp.concatenate(
        [params["w1"], params["b1"], params["w2"], params["b2"],
         params["w3"], params["b3"], w6p, b6p], axis=1)


def student_model_forward(x, params, *, tile_b=32768):
    """x: (B, input_dim) float32 -> (B, 2) float32."""
    B, d_in = x.shape
    out_dim = params["w6"].shape[0]

    # Batch tile: multiple of 128 (lane width).  Large by default to amortize the
    # per-grid-step overhead, but shrunk so the grid keeps >= ~4 steps on big batches
    # (2 TCs on v7x x pipelining), never below 512 lanes, never above the padded batch.
    b_pad = _round_up(B, 128)
    tb = min(tile_b, max(512, _round_up(pl.cdiv(b_pad, 4), 128)), b_pad)
    grid = pl.cdiv(B, tb)          # trailing partial block is masked by Pallas

    pack = _pack_params(params)

    cost = pl.CostEstimate(
        flops=2 * B * (d_in * 3 + 3 * 3 + 3 * 3 + 3 * out_dim),
        transcendentals=0,
        bytes_accessed=4 * B * (d_in + out_dim) + 4 * pack.size)

    out_t = pl.pallas_call(
        functools.partial(_mlp_kernel, d_in=d_in),
        out_shape=jax.ShapeDtypeStruct((out_dim, B), jnp.float32),
        grid=(grid,),
        in_specs=[
            pl.BlockSpec((tb, d_in), lambda i: (i, 0)),       # natural-layout x tile
            pl.BlockSpec(pack.shape, lambda i: (0, 0)),       # VMEM-resident param pack
        ],
        out_specs=pl.BlockSpec((out_dim, tb), lambda i: (0, i)),  # lane-dense output
        compiler_params=pltpu.CompilerParams(
            dimension_semantics=("parallel",)),               # shards across TCs (v7x)
        cost_estimate=cost,
    )(x, pack)

    return out_t.T                                            # (B, out_dim)


def init_params(input_dim, key):
    """Deterministic init mimicking PyTorch nn.Linear (uniform +/- 1/sqrt(fan_in)).

    Weights kept in PyTorch (out, in) layout; biases stored as (out, 1).
    """
    dims = [(input_dim, 3), (3, 3), (3, 3), (3, 2)]
    names = ["1", "2", "3", "6"]
    params = {}
    for (fan_in, fan_out), name in zip(dims, names):
        key, kw, kb = jax.random.split(key, 3)
        bound = 1.0 / jnp.sqrt(jnp.float32(fan_in))
        params[f"w{name}"] = jax.random.uniform(
            kw, (fan_out, fan_in), jnp.float32, -bound, bound)
        params[f"b{name}"] = jax.random.uniform(
            kb, (fan_out, 1), jnp.float32, -bound, bound)
    return params


def _reference_forward(x, p):
    h = jnp.maximum(x @ p["w1"].T + p["b1"][:, 0], 0.0)
    h = jnp.maximum(h @ p["w2"].T + p["b2"][:, 0], 0.0)
    h = jnp.maximum(h @ p["w3"].T + p["b3"][:, 0], 0.0)
    return h @ p["w6"].T + p["b6"][:, 0]


if __name__ == "__main__":
    key = jax.random.PRNGKey(0)
    key, kx = jax.random.split(key)

    batch, input_dim = 8, 32
    x = jax.random.normal(kx, (batch, input_dim), jnp.float32)
    params = init_params(input_dim, key)

    # Small-batch check: single grid step, fully masked partial (128-lane) tile.
    out = jax.block_until_ready(student_model_forward(x, params))
    ref = _reference_forward(x, params)
    assert out.shape == (batch, 2)
    assert jnp.allclose(out, ref, atol=1e-5, rtol=1e-5)

    # Larger batch: multi-step grid (grid=2 at tb=512) with a masked trailing
    # partial block (1000 rows over two 512-lane tiles) and no wrapper-side padding.
    key, kx2 = jax.random.split(key)
    x_big = jax.random.normal(kx2, (1000, input_dim), jnp.float32)
    out_big = jax.block_until_ready(student_model_forward(x_big, params))
    ref_big = _reference_forward(x_big, params)
    assert out_big.shape == (1000, 2)
    assert jnp.allclose(out_big, ref_big, atol=1e-5, rtol=1e-5)

    print("KERNEL_OK")
</pallas_src>

<mosaic_0001>
module attributes {stable_mosaic.version = 11 : i64} {
  func.func @_mlp_kernel(%arg0: i32, %arg1: memref<128x32xf32, #tpu.memory_space<vmem>>, %arg2: memref<3x45xf32, #tpu.memory_space<vmem>>, %arg3: memref<2x128xf32, #tpu.memory_space<vmem>>) attributes {dimension_semantics = [#tpu.dimension_semantics<parallel>], iteration_bounds = array<i64: 1>, scalar_prefetch = 0 : i64, scratch_operands = 0 : i64, tpu.core_type = #tpu.core_type<tc>, window_params = [{transform_indices = @transform_0, window_bounds = array<i64: 128, 32>}, {pipeline_mode = #tpu.pipeline_mode<synchronous>, transform_indices = @transform_1, window_bounds = array<i64: 3, 45>}, {transform_indices = @transform_2, window_bounds = array<i64: 2, 128>}]} {
    %c0 = arith.constant 0 : index
    %c0_0 = arith.constant 0 : index
    %0 = vector.load %arg1[%c0, %c0_0] : memref<128x32xf32, #tpu.memory_space<vmem>>, vector<128x32xf32>
    %c0_1 = arith.constant 0 : index
    %c0_2 = arith.constant 0 : index
    %1 = vector.load %arg2[%c0_1, %c0_2] : memref<3x45xf32, #tpu.memory_space<vmem>>, vector<3x45xf32>
    %2 = vector.extract_strided_slice %1 {offsets = [0, 0], sizes = [3, 32], strides = [1, 1]} : vector<3x45xf32> to vector<3x32xf32>
    %3 = vector.extract_strided_slice %1 {offsets = [0, 32], sizes = [3, 1], strides = [1, 1]} : vector<3x45xf32> to vector<3x1xf32>
    %4 = vector.extract_strided_slice %1 {offsets = [0, 33], sizes = [3, 3], strides = [1, 1]} : vector<3x45xf32> to vector<3x3xf32>
    %5 = vector.extract_strided_slice %1 {offsets = [0, 36], sizes = [3, 1], strides = [1, 1]} : vector<3x45xf32> to vector<3x1xf32>
    %6 = vector.extract_strided_slice %1 {offsets = [0, 37], sizes = [3, 3], strides = [1, 1]} : vector<3x45xf32> to vector<3x3xf32>
    %7 = vector.extract_strided_slice %1 {offsets = [0, 40], sizes = [3, 1], strides = [1, 1]} : vector<3x45xf32> to vector<3x1xf32>
    %8 = vector.extract_strided_slice %1 {offsets = [0, 41], sizes = [2, 3], strides = [1, 1]} : vector<3x45xf32> to vector<2x3xf32>
    %9 = vector.extract_strided_slice %1 {offsets = [0, 44], sizes = [2, 1], strides = [1, 1]} : vector<3x45xf32> to vector<2x1xf32>
    %cst = arith.constant dense<0.000000e+00> : vector<3x128xf32>
    %10 = tpu.matmul %2, %0, %cst {dimension_numbers = #tpu.dot_dimension_numbers<[1], [1], [0], [0], [0, 0, 1, 0], [], []>} : vector<3x32xf32>, vector<128x32xf32>, vector<3x128xf32> -> vector<3x128xf32>
    %11 = vector.broadcast %3 : vector<3x1xf32> to vector<3x128xf32>
    %12 = arith.addf %10, %11 : vector<3x128xf32>
    %cst_3 = arith.constant 0.000000e+00 : f32
    %13 = vector.broadcast %cst_3 : f32 to vector<3x128xf32>
    %14 = arith.maximumf %12, %13 : vector<3x128xf32>
    %cst_4 = arith.constant dense<0.000000e+00> : vector<3x128xf32>
    %15 = tpu.matmul %4, %14, %cst_4 {dimension_numbers = #tpu.dot_dimension_numbers<[1], [0], [0], [1], [0, 0, 1, 1], [], []>} : vector<3x3xf32>, vector<3x128xf32>, vector<3x128xf32> -> vector<3x128xf32>
    %16 = vector.broadcast %5 : vector<3x1xf32> to vector<3x128xf32>
    %17 = arith.addf %15, %16 : vector<3x128xf32>
    %cst_5 = arith.constant 0.000000e+00 : f32
    %18 = vector.broadcast %cst_5 : f32 to vector<3x128xf32>
    %19 = arith.maximumf %17, %18 : vector<3x128xf32>
    %cst_6 = arith.constant dense<0.000000e+00> : vector<3x128xf32>
    %20 = tpu.matmul %6, %19, %cst_6 {dimension_numbers = #tpu.dot_dimension_numbers<[1], [0], [0], [1], [0, 0, 1, 1], [], []>} : vector<3x3xf32>, vector<3x128xf32>, vector<3x128xf32> -> vector<3x128xf32>
    %21 = vector.broadcast %7 : vector<3x1xf32> to vector<3x128xf32>
    %22 = arith.addf %20, %21 : vector<3x128xf32>
    %cst_7 = arith.constant 0.000000e+00 : f32
    %23 = vector.broadcast %cst_7 : f32 to vector<3x128xf32>
    %24 = arith.maximumf %22, %23 : vector<3x128xf32>
    %cst_8 = arith.constant dense<0.000000e+00> : vector<2x128xf32>
    %25 = tpu.matmul %8, %24, %cst_8 {dimension_numbers = #tpu.dot_dimension_numbers<[1], [0], [0], [1], [0, 0, 1, 1], [], []>} : vector<2x3xf32>, vector<3x128xf32>, vector<2x128xf32> -> vector<2x128xf32>
    %26 = vector.broadcast %9 : vector<2x1xf32> to vector<2x128xf32>
    %27 = arith.addf %25, %26 : vector<2x128xf32>
    %c0_9 = arith.constant 0 : index
    %c0_10 = arith.constant 0 : index
    %28 = vector.load %arg3[%c0_9, %c0_10] : memref<2x128xf32, #tpu.memory_space<vmem>>, vector<2x128xf32>
    tpu.vector_store %arg3[%c0_9, %c0_10], %27 {strides = array<i32>} : memref<2x128xf32, #tpu.memory_space<vmem>>, vector<2x128xf32>,
    return
  }
  func.func @transform_0(%arg0: i32) -> (i32, i32) {
    %c0_i32 = arith.constant 0 : i32
    %c0_i32_0 = arith.constant 0 : i32
    return %arg0, %c0_i32 : i32, i32
  }
  func.func @transform_1(%arg0: i32) -> (i32, i32) {
    %c0_i32 = arith.constant 0 : i32
    %c0_i32_0 = arith.constant 0 : i32
    %c0_i32_1 = arith.constant 0 : i32
    return %c0_i32, %c0_i32_0 : i32, i32
  }
  func.func @transform_2(%arg0: i32) -> (i32, i32) {
    %c0_i32 = arith.constant 0 : i32
    %c0_i32_0 = arith.constant 0 : i32
    return %c0_i32, %arg0 : i32, i32
  }
}

</mosaic_0001>

<bundles_post_ra>
// kernel: tpu_custom_call.1
= control target key start
LH: loop header
LB: loop body
LE: loop exit
PB: predicated region body
PF: predicated region fallthrough
CT: control target
= control target key end

     0   :  { %7 = vsyncpa [#allocation3], 0  ;;  %s782_s0 = inlined_call_operand.hbm [shape: f32[8,32], index: 0, kind: input, shape index: {}]   ;;  %s783_s1 = inlined_call_operand.hbm [shape: f32[3,45], index: 1, kind: input, shape index: {}]   ;;  %s784_s2 = inlined_call_operand.hbm [shape: f32[2,8], index: 2, kind: output, shape index: {}]  }
   0x1   :  { %8 = vsyncpa [#allocation6], 0 }
   0x2   :  { %9 = vsyncpa [#allocation4], 0 }
   0x3   :  { %14 = vsyncadd [#allocation3], 1920  ;;  %s666_s9 = smov [#allocation2]   ;;  %s594_s13 = scalar_lea.hbm %s782_s0, 128 }
   0x4   :  { %s15_s10 = sshll.u32 %s666_s9, 4  ;;  %p595_p0 = scmp.ne.s32.totalorder %s782_s0, %s594_s13  ;;  %s16_s10 = int_to_ptr.vmem [resolvable:$true] %s15_s10 }
   0x5   :  { %p598_p1 = scmp.lt.u32.totalorder %s594_s13, %s782_s0 }
   0x7   :  { %p600_p2 = pnand %p598_p1, %p595_p0 }
   0x9   :  { %603 = shalt.err (!%p600_p2)
}
   0xa   :  { %s604_s18 = scalar_lea.vmem %s16_s10, 128  ;;  %s608_s19 = scalar_lea.vmem %s16_s10, 2048 }
   0xb   :  { %p605_p3 = scmp.ne.s32.totalorder %s16_s10, %s604_s18  ;;  %p609_p4 = scmp.lt.s32.totalorder %s16_s10, %s16_s10 }
   0xc   :  { %p610_p5 = scmp.lt.s32.totalorder %s608_s19, %s604_s18 }
   0xe   :  { %p611_p6 = por %p610_p5, %p609_p4 }
  0x10   :  { %p612_p7 = pnand %p611_p6, %p605_p3 }
  0x12   :  { %615 = shalt.err (!%p612_p7)
}
  0x13   :  { %s667_s20 = smov 128   ;;  %s668_s21 = smov 8  }
  0x14   :  { %21 = dma.hbm_to_vmem [thread:$0]  %s782_s0, 128, %s16_s10, [#allocation3], %s667_s20, %s667_s20, %s668_s21  }
  0x15   :  { %s669_s24 = smov [#allocation5]   ;;  %s616_s28 = scalar_lea.hbm %s783_s1, 64 }
  0x16   :  { %s28_s25 = sshll.u32 %s669_s24, 4  ;;  %p617_p8 = scmp.ne.s32.totalorder %s783_s1, %s616_s28  ;;  %s29_s25 = int_to_ptr.vmem [resolvable:$true] %s28_s25 }
  0x17   :  { %p620_p9 = scmp.lt.u32.totalorder %s616_s28, %s783_s1 }
  0x19   :  { %p622_p10 = pnand %p620_p9, %p617_p8 }
  0x1b   :  { %625 = shalt.err (!%p622_p10)
}
  0x1c   :  { %s626_s5 = scalar_lea.vmem %s29_s25, 64  ;;  %p631_p12 = scmp.lt.s32.totalorder %s29_s25, %s29_s25 }
  0x1d   :  { %p627_p11 = scmp.ne.s32.totalorder %s29_s25, %s626_s5  ;;  %p632_p13 = scmp.lt.s32.totalorder %s626_s5, %s626_s5 }
  0x1f   :  { %p633_p0 = por %p632_p13, %p631_p12 }
  0x21   :  { %p634_p1 = pnand %p633_p0, %p627_p11 }
  0x23   :  { %637 = shalt.err (!%p634_p1)
}
  0x24   :  { %31 = dma.hbm_to_vmem [thread:$0]  %s783_s1, 64, %s29_s25, [#allocation6]  }
  0x25   :  { %660 = dma.done.wait [#allocation3], 2048  }
  0x26   :  { %661 = vsyncadd [#allocation3], 4294965248 }
  0x27   :  { %662 = dma.done.wait [#allocation6], 64  }
  0x28   :  { %663 = vsyncadd [#allocation6], 4294967232  ;;  %v670_v0 = vmov 0.0|0.0   ;;  %vm671_vm0 = vmmov 0   ;;  %v672_v1 = vmov 0.0   ;;  %v673_v2 = vmov 32  }
  0x29   :  { %542 = vmatprep.subr.bf16.mxu0 %v670_v0  ;;  %524 = vmatprep.mubr.msk.f32.mxu0 %vm671_vm0, %v672_v1  ;;  %vm60_vm1 = vcmask 261120   ;;  %v38_v3 = vld [vmem:[#allocation2] sm:$0xff]  ;;  %v39_v4 = vld [vmem:[#allocation2 + $0x8] sm:$0xff]  ;;  %v40_v7 = vld [vmem:[#allocation2 + $0x10] sm:$0xff]  ;;  %s674_s1 = smov 95   ;;  %v675_v29 = vmov 36  }
  0x2a   :  { %589 = vset.pattern.permute.xlu0 %v673_v2  ;;  %527 = vmatprep.subr.mxu1 %v672_v1  ;;  %vm727_vm2 = vmpackc.low %vm60_vm1, %vm60_vm1  ;;  %v543_v6 = vpack.c.bf16 %v39_v4, %v38_v3  ;;  %v41_v8 = vld [vmem:[#allocation2 + $0x18] sm:$0xff]  ;;  %v733_v9 = vld [vmem:[#allocation5] sm:$0x7]  ;;  %s676_s7 = smov 91   ;;  %vm191_vm3 = vcmask 1042432   ;;  %vm188_vm4 = vcmask 23552  }
  0x2b   :  { %529 = vmatprep.mubr.msk.f32.mxu1 %vm671_vm0, %v672_v1  ;;  %57 = vperm.xlu0 %589, %v733_v9   ;;  %v547_v10 = vpack.c.bf16 %v41_v8, %v40_v7  ;;  %v42_v11 = vld [vmem:[#allocation2 + $0x20] sm:$0xff]  ;;  %v43_v12 = vld [vmem:[#allocation2 + $0x28] sm:$0xff]  ;;  %v44_v14 = vld [vmem:[#allocation2 + $0x30] sm:$0xff]  ;;  %v677_v36 = vmov 40   ;;  %s678_s8 = smov 87   ;;  %v679_v43 = vmov 44  }
  0x2c   :  { %545 = vmatpush3.bf16.xpose.msk.msra.mxu0 %vm727_vm2, %v543_v6  ;;  %v551_v13 = vpack.c.bf16 %v43_v12, %v42_v11  ;;  %v45_v15 = vld [vmem:[#allocation2 + $0x38] sm:$0xff]  ;;  %v46_v17 = vld [vmem:[#allocation2 + $0x40] sm:$0xff]  ;;  %v47_v18 = vld [vmem:[#allocation2 + $0x48] sm:$0xff]  ;;  %590 = vset.pattern.permute.xlu1 %v675_v29  ;;  %s680_s9 = smov [#allocation7]  }
  0x2d   :  { %546 = vmatprep.subr.bf16.mxu0 %v670_v0  ;;  %v555_v16 = vpack.c.bf16 %v45_v15, %v44_v14  ;;  %v559_v19 = vpack.c.bf16 %v47_v18, %v46_v17  ;;  %v48_v20 = vld [vmem:[#allocation2 + $0x50] sm:$0xff]  ;;  %v49_v21 = vld [vmem:[#allocation2 + $0x58] sm:$0xff]  ;;  %v50_v23 = vld [vmem:[#allocation2 + $0x60] sm:$0xff]  ;;  %183 = vperm.xlu1 %590, %v733_v9   ;;  %s436_s10 = sshll.u32 %s680_s9, 4  ;;  %s437_s10 = int_to_ptr.vmem [resolvable:$true] %s436_s10 }
  0x2e   :  { %v563_v22 = vpack.c.bf16 %v49_v21, %v48_v20  ;;  %v51_v24 = vld [vmem:[#allocation2 + $0x68] sm:$0xff]  ;;  %v52_v26 = vld [vmem:[#allocation2 + $0x70] sm:$0xff]  ;;  %v53_v27 = vld [vmem:[#allocation2 + $0x78] sm:$0xff]  ;;  %s638_s11 = scalar_lea.vmem %s437_s10, 32  ;;  %p643_p3 = scmp.lt.s32.totalorder %s437_s10, %s437_s10 }
  0x2f   :  { %186 = vrot.lane.b32.xlu0 %v733_v9, %s674_s1  ;;  %v567_v25 = vpack.c.bf16 %v51_v24, %v50_v23  ;;  %v571_v28 = vpack.c.bf16 %v53_v27, %v52_v26  ;;  %p639_p2 = scmp.ne.s32.totalorder %s437_s10, %s638_s11  ;;  %p644_p4 = scmp.lt.s32.totalorder %s638_s11, %s638_s11 }
  0x30   :  { %591 = vset.pattern.permute.xlu0 %v677_v36 }
  0x31   :  { %270 = vrot.lane.b32.xlu1 %v733_v9, %s676_s7  ;;  %p645_p5 = por %p644_p4, %p643_p3 }
  0x32   :  { %592 = vset.pattern.permute.xlu1 %v679_v43 }
  0x33   :  { %267 = vperm.xlu0 %591, %v733_v9   ;;  %p646_p6 = pnand %p645_p5, %p639_p2 }
  0x34   :  { %549 = vmatpush3.bf16.xpose.msk.msra.mxu0 %vm727_vm2, %v547_v10 }
  0x35   :  { %550 = vmatprep.subr.bf16.mxu0 %v670_v0  ;;  %352 = vrot.lane.b32.xlu1 %v733_v9, %s678_s8 }
  0x37   :  { %593 = vset.pattern.permute.xlu0 %v679_v43 }
  0x39   :  { %349 = vperm.xlu1 %592, %v733_v9  }
  0x3c   :  { %553 = vmatpush3.bf16.xpose.msk.msra.mxu0 %vm727_vm2, %v551_v13 }
  0x3d   :  { %554 = vmatprep.subr.bf16.mxu0 %v670_v0 }
  0x44   :  { %557 = vmatpush3.bf16.xpose.msk.msra.mxu0 %vm727_vm2, %v555_v16 }
  0x45   :  { %558 = vmatprep.subr.bf16.mxu0 %v670_v0 }
  0x4c   :  { %561 = vmatpush3.bf16.xpose.msk.msra.mxu0 %vm727_vm2, %v559_v19 }
  0x4d   :  { %562 = vmatprep.subr.bf16.mxu0 %v670_v0 }
  0x54   :  { %565 = vmatpush3.bf16.xpose.msk.msra.mxu0 %vm727_vm2, %v563_v22 }
  0x55   :  { %566 = vmatprep.subr.bf16.mxu0 %v670_v0 }
  0x5c   :  { %569 = vmatpush3.bf16.xpose.msk.msra.mxu0 %vm727_vm2, %v567_v25 }
  0x5d   :  { %570 = vmatprep.subr.bf16.mxu0 %v670_v0 }
  0x64   :  { %573 = vmatpush3.bf16.xpose.msk.msra.mxu0 %vm727_vm2, %v571_v28 }
  0x6b   :  { %525 = vmatmul.mubr.msk.f32.vlgmr.msra.gmra.mrb[0].mxu0 %vm60_vm1, %v733_v9 }
  0xaa   :  { %v58_v30 = vpop.permute.xlu0 %57 }
  0xac   :  { %v184_v37 = vpop.permute.xlu1 %183 }
  0xae   :  { %v187_v35 = vpop.permute.xlu0 %186 }
  0xb0   :  { %v271_v42 = vpop.permute.xlu1 %270 }
  0xb2   :  { %v268_v44 = vpop.permute.xlu0 %267 }
  0xb4   :  { %v353_v49 = vpop.permute.xlu1 %352 }
  0xb8   :  { %v350_v50 = vpop.permute.xlu1 %349 }
 0x13e   :  { %v177_v31 = vpop.f32.mrb[0].mxu0 }
 0x13f   :  { %v178_v32 = vadd.f32 %v177_v31, %v58_v30  ;;  %v526_v33 = vpop.f32.mrb[1].mxu0 }
 0x141   :  { %v181_v34 = vmax.f32 %v178_v32, 0.0 }
 0x143   :  { %528 = vmatpush3.msk.msra.mxu1 %vm191_vm3, %v181_v34 }
 0x144   :  { %530 = vmatmul.mubr.msk.f32.vlgmr.msra.gmra.mrb[0].mxu1 %vm188_vm4, %v187_v35  ;;  %532 = vmatprep.subr.mxu1 %v672_v1 }
 0x145   :  { %534 = vmatprep.mubr.msk.f32.mxu1 %vm671_vm0, %v672_v1 }
 0x217   :  { %v261_v38 = vpop.f32.mrb[0].mxu1 }
 0x218   :  { %v262_v39 = vadd.f32 %v261_v38, %v184_v37  ;;  %v531_v40 = vpop.f32.mrb[1].mxu1 }
 0x21a   :  { %v265_v41 = vmax.f32 %v262_v39, 0.0 }
 0x21c   :  { %533 = vmatpush3.msk.msra.mxu1 %vm191_vm3, %v265_v41 }
 0x21d   :  { %535 = vmatmul.mubr.msk.f32.vlgmr.msra.gmra.mrb[2].mxu1 %vm188_vm4, %v271_v42  ;;  %537 = vmatprep.subr.mxu1 %v672_v1 }
 0x21e   :  { %539 = vmatprep.mubr.msk.f32.mxu1 %vm671_vm0, %v672_v1 }
 0x2f0   :  { %v343_v45 = vpop.f32.mrb[2].mxu1 }
 0x2f1   :  { %v344_v46 = vadd.f32 %v343_v45, %v268_v44  ;;  %v536_v47 = vpop.f32.mrb[3].mxu1 }
 0x2f3   :  { %v347_v48 = vmax.f32 %v344_v46, 0.0 }
 0x2f5   :  { %538 = vmatpush3.msk.msra.mxu1 %vm191_vm3, %v347_v48 }
 0x2f6   :  { %540 = vmatmul.mubr.msk.f32.vlgmr.msra.gmra.mrb[4].mxu1 %vm188_vm4, %v353_v49 }
 0x3c9   :  { %v425_v51 = vpop.f32.mrb[4].mxu1 }
 0x3ca   :  { %v426_v52 = vadd.f32 %v425_v51, %v350_v50  ;;  %v541_v53 = vpop.f32.mrb[5].mxu1 }
 0x3cc   :  { %429 = vst [vmem:[#allocation7] sm:$0x3] %v426_v52 }
 0x3cd   :  { %649 = shalt.err (!%p646_p6)
}
 0x3ce   :  { %s650_s14 = scalar_lea.hbm %s784_s2, 32 }
 0x3cf   :  { %p651_p7 = scmp.ne.s32.totalorder %s784_s2, %s650_s14  ;;  %p654_p8 = scmp.lt.u32.totalorder %s650_s14, %s784_s2 }
 0x3d1   :  { %p656_p9 = pnand %p654_p8, %p651_p7 }
 0x3d3   :  { %659 = shalt.err (!%p656_p9)
}
 0x3d4   :  { %439 = dma.vmem_to_hbm [thread:$0]  %s437_s10, 32, %s784_s2, [#allocation4]  }
 0x3d5   :  { %664 = dma.done.wait [#allocation4], 32  }
 0x3d6   :  { %665 = vsyncadd [#allocation4], 4294967264 }
 0x3d7   :  { %443 = vsyncpa [#allocation3], 1 }
 0x3d8   :  { %444 = vsyncpa [#allocation6], 1 }
 0x3d9   :  { %445 = vsyncpa [#allocation4], 1 }

</bundles_post_ra>
